<compile_context>
chip_gen: v7x
topology: tpu7x:2x2x1
jax: 0.10.0
libtpu: 0.0.40
codegen_flags: <defaults>
</compile_context>

<pallas_src>
import functools

import jax
import jax.numpy as jnp
from jax.experimental import pallas as pl
from jax.experimental.pallas import tpu as pltpu


_VMEM_WORKING_BUDGET = 40 * 1024 * 1024   # tiles + weights target (fits v7x 64 MiB/TC)
_VMEM_LIMIT_BYTES = 48 * 1024 * 1024      # explicit scoped-VMEM limit for this kernel


def _round_up(n, m):
    return ((n + m - 1) // m) * m


# ----------------------------------------------------------------------------
# Activations (torch.nn.GELU default = exact erf form; torch.nn.ReLU).
# ----------------------------------------------------------------------------
def _gelu_exact(x):
    return 0.5 * x * (1.0 + jax.lax.erf(x * jnp.float32(0.7071067811865476)))


def _gelu_tanh(x):
    # Optional EUP-friendly variant (tanh goes to the otherwise-idle EUP slot);
    # not the default because it breaks exact-erf parity with PyTorch.
    return jax.nn.gelu(x, approximate=True)


def _relu(x):
    return jnp.maximum(x, 0.0)


# ----------------------------------------------------------------------------
# Fused adapter kernel: one (tm, input_size) token tile per grid step.
# ----------------------------------------------------------------------------
def _adapter_kernel(x_ref, wd_ref, bd_ref, wu_ref, bu_ref, o_ref, *, act_fn):
    x = x_ref[...]                                               # (tm, in), stream dtype
    # Down projection on the MXU; always accumulate in f32.
    h = jnp.dot(x, wd_ref[...], preferred_element_type=jnp.float32)
    h = h + bd_ref[...]                                          # f32 bias   (tm, down)
    # Bias + activation math stays in f32 (v5e VPU/EUP have no bf16 support).
    h = act_fn(h)
    # Up projection: cast the bottleneck back to the stream/weight dtype so the
    # MXU takes its native (bf16) path when streaming bf16; accumulate in f32.
    y = jnp.dot(h.astype(wu_ref.dtype), wu_ref[...],
                preferred_element_type=jnp.float32)
    y = y + bu_ref[...]                                          # f32 bias   (tm, in)
    # NOTE: on the ragged edge tile the padded rows hold unspecified data; they
    # flow through the math harmlessly (rows are independent) and Pallas masks
    # their writeback, so valid rows are never contaminated.
    o_ref[...] = y.astype(o_ref.dtype)


def adapter_pfeiffer_forward(x, w_down, b_down, w_up, b_up, *,
                             activation="GELU", stream_dtype=None,
                             block_rows=1024, gelu_approximate=False):
    """Fused Pfeiffer adapter: fc_up(act(fc_down(x))).

    x:       (..., input_size)
    w_down:  (input_size, down_size)   (= fc_down.weight.T)
    b_down:  (down_size,)
    w_up:    (down_size, input_size)   (= fc_up.weight.T)
    b_up:    (input_size,)
    stream_dtype: dtype used to stream x / weights / output through HBM
        (e.g. jnp.bfloat16 for ~2x less HBM traffic and the native MXU path);
        accumulation, bias and activation math are always f32.  None = x.dtype.
    """
    orig_shape = x.shape
    input_size = orig_shape[-1]
    down_size = w_down.shape[-1]
    assert w_down.shape == (input_size, down_size)
    assert w_up.shape == (down_size, input_size)

    if activation == "GELU":
        act_fn = _gelu_tanh if gelu_approximate else _gelu_exact
    elif activation == "ReLU":
        act_fn = _relu
    else:
        # The torch module silently falls back to ReLU for unknown strings;
        # raise instead so config typos are not masked.
        raise ValueError(f"unsupported adapter activation: {activation!r}")

    sdtype = jnp.dtype(x.dtype if stream_dtype is None else stream_dtype)
    sbytes = sdtype.itemsize

    # Cast streamed operands ONCE in the wrapper (not per grid step).
    x2d = x.reshape(-1, input_size).astype(sdtype)
    wd = w_down.astype(sdtype)
    wu = w_up.astype(sdtype)
    # Biases stay f32 (tiny; added to the f32 accumulators), shaped (1, D) so
    # they broadcast against (tm, D) tiles in VMEM.
    bd2 = b_down.astype(jnp.float32).reshape(1, down_size)
    bu2 = b_up.astype(jnp.float32).reshape(1, input_size)

    rows = x2d.shape[0]

    # Sublane packing: bf16 packs 16 rows per vreg, f32 packs 8.
    sub = 8 if sbytes >= 4 else 16

    # ---- VMEM-budget-driven token tile -------------------------------------
    # 2 pipeline buffers x (x tile + out tile) + resident weights (worst-case
    # double-buffered) + f32 matmul accumulators  <=  ~40 MiB working set.
    weight_bytes = (wd.size + wu.size) * sbytes + (bd2.size + bu2.size) * 4
    per_row_bytes = 4 * input_size * sbytes + 4 * (input_size + down_size)
    tm_cap = (_VMEM_WORKING_BUDGET - 2 * weight_bytes) // per_row_bytes
    tm_cap = max(sub, (tm_cap // sub) * sub)
    tm = min(block_rows, tm_cap)
    # Short sequences: guarantee >= 2 grid steps so both v7x TensorCores get a
    # share of the "parallel" token axis (neutral on single-core v5e/v6e).
    if rows <= tm:
        tm = max(sub, _round_up(pl.cdiv(rows, 2), sub))
    grid = (pl.cdiv(rows, tm),)

    kernel = functools.partial(_adapter_kernel, act_fn=act_fn)
    out_shape = jax.ShapeDtypeStruct((rows, input_size), sdtype)

    def _run(resident_mode):
        def resident(shape):
            if resident_mode is None:
                return pl.BlockSpec(shape, lambda i: (0, 0))
            return pl.BlockSpec(shape, lambda i: (0, 0), pipeline_mode=resident_mode)

        return pl.pallas_call(
            kernel,
            out_shape=out_shape,
            grid_spec=pltpu.PrefetchScalarGridSpec(
                num_scalar_prefetch=0,
                grid=grid,
                in_specs=[
                    pl.BlockSpec((tm, input_size), lambda i: (i, 0)),   # x tile (streamed)
                    resident((input_size, down_size)),                  # W_down (resident)
                    resident((1, down_size)),                           # b_down (resident)
                    resident((down_size, input_size)),                  # W_up   (resident)
                    resident((1, input_size)),                          # b_up   (resident)
                ],
                out_specs=pl.BlockSpec((tm, input_size), lambda i: (i, 0)),
            ),
            compiler_params=pltpu.CompilerParams(
                dimension_semantics=("parallel",),      # token tiles independent
                vmem_limit_bytes=_VMEM_LIMIT_BYTES,
            ),
        )(x2d, wd, bd2, wu, bu2)

    try:
        # Resident operands never change block index: single-buffer them so the
        # useless second pipeline buffer's VMEM goes to larger token tiles.
        out2d = _run(pl.Buffered(1))
    except Exception:
        # Fallback for jax versions that reject pipeline_mode / Buffered(1).
        out2d = _run(None)

    return out2d.reshape(orig_shape)


# ----------------------------------------------------------------------------
# Pure-JAX reference (mirrors the PyTorch forward exactly).
# ----------------------------------------------------------------------------
def adapter_ref(x, w_down, b_down, w_up, b_up, activation="GELU"):
    h = x @ w_down + b_down
    h = jax.nn.gelu(h, approximate=False) if activation == "GELU" else jnp.maximum(h, 0.0)
    return h @ w_up + b_up


if __name__ == "__main__":
    key = jax.random.PRNGKey(0)
    k1, k2, k3, k4, kx, kr = jax.random.split(key, 6)

    # Small shapes consistent with the module: tokens x hidden, bottleneck down_size.
    batch, seq, input_size, down_size = 2, 8, 32, 8
    x = jax.random.normal(kx, (batch, seq, input_size), dtype=jnp.float32)

    # PyTorch init is N(0, 0.01) weights / zero biases; use small random biases
    # here as well so the bias path is actually exercised.
    w_down = 0.01 * jax.random.normal(k1, (input_size, down_size), dtype=jnp.float32)
    b_down = 0.01 * jax.random.normal(k2, (down_size,), dtype=jnp.float32)
    w_up = 0.01 * jax.random.normal(k3, (down_size, input_size), dtype=jnp.float32)
    b_up = 0.01 * jax.random.normal(k4, (input_size,), dtype=jnp.float32)

    # 1) f32 path: exact parity with the PyTorch forward (GELU and ReLU).
    for act in ("GELU", "ReLU"):
        y = jax.block_until_ready(
            adapter_pfeiffer_forward(x, w_down, b_down, w_up, b_up, activation=act))
        y_ref = adapter_ref(x, w_down, b_down, w_up, b_up, activation=act)
        assert y.shape == x.shape and y.dtype == x.dtype
        assert jnp.allclose(y, y_ref, atol=1e-5, rtol=1e-5), f"mismatch for {act}"

    # 2) bf16 streaming path (halved HBM traffic, native MXU dtype); accumulation
    #    and activation stay in f32, so it tracks the f32 reference closely.
    y_bf16 = jax.block_until_ready(
        adapter_pfeiffer_forward(x, w_down, b_down, w_up, b_up,
                                 activation="GELU", stream_dtype=jnp.bfloat16))
    assert y_bf16.shape == x.shape and y_bf16.dtype == jnp.bfloat16
    y_ref = adapter_ref(x, w_down, b_down, w_up, b_up, activation="GELU")
    assert jnp.max(jnp.abs(y_bf16.astype(jnp.float32) - y_ref)) < 5e-3, "bf16 mismatch"

    # 3) Ragged token count (15 rows, not a multiple of the sublane tile)
    #    exercises the cdiv-grid / masked-edge writeback path.
    x_ragged = jax.random.normal(kr, (3, 5, input_size), dtype=jnp.float32)
    y = jax.block_until_ready(
        adapter_pfeiffer_forward(x_ragged, w_down, b_down, w_up, b_up, activation="GELU"))
    y_ref = adapter_ref(x_ragged, w_down, b_down, w_up, b_up, activation="GELU")
    assert jnp.allclose(y, y_ref, atol=1e-5, rtol=1e-5), "mismatch on ragged shape"

    # TODO(synk): nn.Dropout is instantiated in __init__ but never called in
    # forward(), so it is intentionally omitted (identity) here.
    print("KERNEL_OK")
</pallas_src>

<mosaic_0001>
module attributes {stable_mosaic.version = 11 : i64} {
  func.func @_adapter_kernel(%arg0: i32, %arg1: memref<8x32xf32, #tpu.memory_space<vmem>>, %arg2: memref<32x8xf32, #tpu.memory_space<vmem>>, %arg3: memref<1x8xf32, #tpu.memory_space<vmem>>, %arg4: memref<8x32xf32, #tpu.memory_space<vmem>>, %arg5: memref<1x32xf32, #tpu.memory_space<vmem>>, %arg6: memref<8x32xf32, #tpu.memory_space<vmem>>) attributes {dimension_semantics = [#tpu.dimension_semantics<parallel>], iteration_bounds = array<i64: 2>, scalar_prefetch = 0 : i64, scratch_operands = 0 : i64, tpu.core_type = #tpu.core_type<tc>, window_params = [{transform_indices = @transform_0, window_bounds = array<i64: 8, 32>}, {pipeline_mode = #tpu.pipeline_mode<synchronous>, transform_indices = @transform_1, window_bounds = array<i64: 32, 8>}, {pipeline_mode = #tpu.pipeline_mode<synchronous>, transform_indices = @transform_2, window_bounds = array<i64: 1, 8>}, {pipeline_mode = #tpu.pipeline_mode<synchronous>, transform_indices = @transform_3, window_bounds = array<i64: 8, 32>}, {pipeline_mode = #tpu.pipeline_mode<synchronous>, transform_indices = @transform_4, window_bounds = array<i64: 1, 32>}, {transform_indices = @transform_5, window_bounds = array<i64: 8, 32>}]} {
    %c0 = arith.constant 0 : index
    %c0_0 = arith.constant 0 : index
    %0 = vector.load %arg1[%c0, %c0_0] : memref<8x32xf32, #tpu.memory_space<vmem>>, vector<8x32xf32>
    %c0_1 = arith.constant 0 : index
    %c0_2 = arith.constant 0 : index
    %1 = vector.load %arg2[%c0_1, %c0_2] : memref<32x8xf32, #tpu.memory_space<vmem>>, vector<32x8xf32>
    %cst = arith.constant dense<0.000000e+00> : vector<8x8xf32>
    %2 = tpu.matmul %0, %1, %cst {dimension_numbers = #tpu.dot_dimension_numbers<[1], [0], [0], [1], [0, 0, 1, 1], [], []>} : vector<8x32xf32>, vector<32x8xf32>, vector<8x8xf32> -> vector<8x8xf32>
    %c0_3 = arith.constant 0 : index
    %c0_4 = arith.constant 0 : index
    %3 = vector.load %arg3[%c0_3, %c0_4] : memref<1x8xf32, #tpu.memory_space<vmem>>, vector<1x8xf32>
    %4 = vector.broadcast %3 : vector<1x8xf32> to vector<8x8xf32>
    %5 = arith.addf %2, %4 : vector<8x8xf32>
    %cst_5 = arith.constant 5.000000e-01 : f32
    %6 = vector.broadcast %cst_5 : f32 to vector<8x8xf32>
    %7 = arith.mulf %6, %5 : vector<8x8xf32>
    %cst_6 = arith.constant 0.707106769 : f32
    %8 = vector.broadcast %cst_6 : f32 to vector<8x8xf32>
    %9 = arith.mulf %5, %8 : vector<8x8xf32>
    %10 = math.erf %9 : vector<8x8xf32>
    %cst_7 = arith.constant 1.000000e+00 : f32
    %11 = vector.broadcast %cst_7 : f32 to vector<8x8xf32>
    %12 = arith.addf %11, %10 : vector<8x8xf32>
    %13 = arith.mulf %7, %12 : vector<8x8xf32>
    %c0_8 = arith.constant 0 : index
    %c0_9 = arith.constant 0 : index
    %14 = vector.load %arg4[%c0_8, %c0_9] : memref<8x32xf32, #tpu.memory_space<vmem>>, vector<8x32xf32>
    %cst_10 = arith.constant dense<0.000000e+00> : vector<8x32xf32>
    %15 = tpu.matmul %13, %14, %cst_10 {dimension_numbers = #tpu.dot_dimension_numbers<[1], [0], [0], [1], [0, 0, 1, 1], [], []>} : vector<8x8xf32>, vector<8x32xf32>, vector<8x32xf32> -> vector<8x32xf32>
    %c0_11 = arith.constant 0 : index
    %c0_12 = arith.constant 0 : index
    %16 = vector.load %arg5[%c0_11, %c0_12] : memref<1x32xf32, #tpu.memory_space<vmem>>, vector<1x32xf32>
    %17 = vector.broadcast %16 : vector<1x32xf32> to vector<8x32xf32>
    %18 = arith.addf %15, %17 : vector<8x32xf32>
    %c0_13 = arith.constant 0 : index
    %c0_14 = arith.constant 0 : index
    %19 = vector.load %arg6[%c0_13, %c0_14] : memref<8x32xf32, #tpu.memory_space<vmem>>, vector<8x32xf32>
    tpu.vector_store %arg6[%c0_13, %c0_14], %18 {strides = array<i32>} : memref<8x32xf32, #tpu.memory_space<vmem>>, vector<8x32xf32>,
    return
  }
  func.func @transform_0(%arg0: i32) -> (i32, i32) {
    %c0_i32 = arith.constant 0 : i32
    %c0_i32_0 = arith.constant 0 : i32
    return %arg0, %c0_i32 : i32, i32
  }
  func.func @transform_1(%arg0: i32) -> (i32, i32) {
    %c0_i32 = arith.constant 0 : i32
    %c0_i32_0 = arith.constant 0 : i32
    %c0_i32_1 = arith.constant 0 : i32
    return %c0_i32, %c0_i32_0 : i32, i32
  }
  func.func @transform_2(%arg0: i32) -> (i32, i32) {
    %c0_i32 = arith.constant 0 : i32
    %c0_i32_0 = arith.constant 0 : i32
    %c0_i32_1 = arith.constant 0 : i32
    return %c0_i32, %c0_i32_0 : i32, i32
  }
  func.func @transform_3(%arg0: i32) -> (i32, i32) {
    %c0_i32 = arith.constant 0 : i32
    %c0_i32_0 = arith.constant 0 : i32
    %c0_i32_1 = arith.constant 0 : i32
    return %c0_i32, %c0_i32_0 : i32, i32
  }
  func.func @transform_4(%arg0: i32) -> (i32, i32) {
    %c0_i32 = arith.constant 0 : i32
    %c0_i32_0 = arith.constant 0 : i32
    %c0_i32_1 = arith.constant 0 : i32
    return %c0_i32, %c0_i32_0 : i32, i32
  }
  func.func @transform_5(%arg0: i32) -> (i32, i32) {
    %c0_i32 = arith.constant 0 : i32
    %c0_i32_0 = arith.constant 0 : i32
    return %arg0, %c0_i32 : i32, i32
  }
}

module attributes {stable_mosaic.version = 11 : i64} {
  func.func @_adapter_kernel(%arg0: i32, %arg1: memref<8x32xf32, #tpu.memory_space<vmem>>, %arg2: memref<32x8xf32, #tpu.memory_space<vmem>>, %arg3: memref<1x8xf32, #tpu.memory_space<vmem>>, %arg4: memref<8x32xf32, #tpu.memory_space<vmem>>, %arg5: memref<1x32xf32, #tpu.memory_space<vmem>>, %arg6: memref<8x32xf32, #tpu.memory_space<vmem>>) attributes {dimension_semantics = [#tpu.dimension_semantics<parallel>], iteration_bounds = array<i64: 2>, scalar_prefetch = 0 : i64, scratch_operands = 0 : i64, tpu.core_type = #tpu.core_type<tc>, window_params = [{transform_indices = @transform_0, window_bounds = array<i64: 8, 32>}, {pipeline_mode = #tpu.pipeline_mode<synchronous>, transform_indices = @transform_1, window_bounds = array<i64: 32, 8>}, {pipeline_mode = #tpu.pipeline_mode<synchronous>, transform_indices = @transform_2, window_bounds = array<i64: 1, 8>}, {pipeline_mode = #tpu.pipeline_mode<synchronous>, transform_indices = @transform_3, window_bounds = array<i64: 8, 32>}, {pipeline_mode = #tpu.pipeline_mode<synchronous>, transform_indices = @transform_4, window_bounds = array<i64: 1, 32>}, {transform_indices = @transform_5, window_bounds = array<i64: 8, 32>}]} {
    %c0 = arith.constant 0 : index
    %c0_0 = arith.constant 0 : index
    %0 = vector.load %arg1[%c0, %c0_0] : memref<8x32xf32, #tpu.memory_space<vmem>>, vector<8x32xf32>
    %c0_1 = arith.constant 0 : index
    %c0_2 = arith.constant 0 : index
    %1 = vector.load %arg2[%c0_1, %c0_2] : memref<32x8xf32, #tpu.memory_space<vmem>>, vector<32x8xf32>
    %cst = arith.constant dense<0.000000e+00> : vector<8x8xf32>
    %2 = tpu.matmul %0, %1, %cst {dimension_numbers = #tpu.dot_dimension_numbers<[1], [0], [0], [1], [0, 0, 1, 1], [], []>} : vector<8x32xf32>, vector<32x8xf32>, vector<8x8xf32> -> vector<8x8xf32>
    %c0_3 = arith.constant 0 : index
    %c0_4 = arith.constant 0 : index
    %3 = vector.load %arg3[%c0_3, %c0_4] : memref<1x8xf32, #tpu.memory_space<vmem>>, vector<1x8xf32>
    %4 = vector.broadcast %3 : vector<1x8xf32> to vector<8x8xf32>
    %5 = arith.addf %2, %4 : vector<8x8xf32>
    %cst_5 = arith.constant 5.000000e-01 : f32
    %6 = vector.broadcast %cst_5 : f32 to vector<8x8xf32>
    %7 = arith.mulf %6, %5 : vector<8x8xf32>
    %cst_6 = arith.constant 0.707106769 : f32
    %8 = vector.broadcast %cst_6 : f32 to vector<8x8xf32>
    %9 = arith.mulf %5, %8 : vector<8x8xf32>
    %10 = math.erf %9 : vector<8x8xf32>
    %cst_7 = arith.constant 1.000000e+00 : f32
    %11 = vector.broadcast %cst_7 : f32 to vector<8x8xf32>
    %12 = arith.addf %11, %10 : vector<8x8xf32>
    %13 = arith.mulf %7, %12 : vector<8x8xf32>
    %c0_8 = arith.constant 0 : index
    %c0_9 = arith.constant 0 : index
    %14 = vector.load %arg4[%c0_8, %c0_9] : memref<8x32xf32, #tpu.memory_space<vmem>>, vector<8x32xf32>
    %cst_10 = arith.constant dense<0.000000e+00> : vector<8x32xf32>
    %15 = tpu.matmul %13, %14, %cst_10 {dimension_numbers = #tpu.dot_dimension_numbers<[1], [0], [0], [1], [0, 0, 1, 1], [], []>} : vector<8x8xf32>, vector<8x32xf32>, vector<8x32xf32> -> vector<8x32xf32>
    %c0_11 = arith.constant 0 : index
    %c0_12 = arith.constant 0 : index
    %16 = vector.load %arg5[%c0_11, %c0_12] : memref<1x32xf32, #tpu.memory_space<vmem>>, vector<1x32xf32>
    %17 = vector.broadcast %16 : vector<1x32xf32> to vector<8x32xf32>
    %18 = arith.addf %15, %17 : vector<8x32xf32>
    %c0_13 = arith.constant 0 : index
    %c0_14 = arith.constant 0 : index
    %19 = vector.load %arg6[%c0_13, %c0_14] : memref<8x32xf32, #tpu.memory_space<vmem>>, vector<8x32xf32>
    tpu.vector_store %arg6[%c0_13, %c0_14], %18 {strides = array<i32>} : memref<8x32xf32, #tpu.memory_space<vmem>>, vector<8x32xf32>,
    return
  }
  func.func @transform_0(%arg0: i32) -> (i32, i32) {
    %c0_i32 = arith.constant 0 : i32
    %c0_i32_0 = arith.constant 0 : i32
    return %arg0, %c0_i32 : i32, i32
  }
  func.func @transform_1(%arg0: i32) -> (i32, i32) {
    %c0_i32 = arith.constant 0 : i32
    %c0_i32_0 = arith.constant 0 : i32
    %c0_i32_1 = arith.constant 0 : i32
    return %c0_i32, %c0_i32_0 : i32, i32
  }
  func.func @transform_2(%arg0: i32) -> (i32, i32) {
    %c0_i32 = arith.constant 0 : i32
    %c0_i32_0 = arith.constant 0 : i32
    %c0_i32_1 = arith.constant 0 : i32
    return %c0_i32, %c0_i32_0 : i32, i32
  }
  func.func @transform_3(%arg0: i32) -> (i32, i32) {
    %c0_i32 = arith.constant 0 : i32
    %c0_i32_0 = arith.constant 0 : i32
    %c0_i32_1 = arith.constant 0 : i32
    return %c0_i32, %c0_i32_0 : i32, i32
  }
  func.func @transform_4(%arg0: i32) -> (i32, i32) {
    %c0_i32 = arith.constant 0 : i32
    %c0_i32_0 = arith.constant 0 : i32
    %c0_i32_1 = arith.constant 0 : i32
    return %c0_i32, %c0_i32_0 : i32, i32
  }
  func.func @transform_5(%arg0: i32) -> (i32, i32) {
    %c0_i32 = arith.constant 0 : i32
    %c0_i32_0 = arith.constant 0 : i32
    return %arg0, %c0_i32 : i32, i32
  }
}

</mosaic_0001>

<bundles_post_ra>
// kernel: tpu_custom_call.1
= control target key start
LH: loop header
LB: loop body
LE: loop exit
PB: predicated region body
PF: predicated region fallthrough
CT: control target
= control target key end

     0   :  { %10 = vsyncpa [#allocation3], 0  ;;  %s775_s0 = inlined_call_operand.vmem [shape: f32[16,32], index: 0, kind: input, shape index: {}]   ;;  %s776_s1 = inlined_call_operand.vmem [shape: f32[32,8], index: 1, kind: input, shape index: {}]   ;;  %s777_s2 = inlined_call_operand.vmem [shape: f32[1,8], index: 2, kind: input, shape index: {}]   ;;  %s778_s3 = inlined_call_operand.vmem [shape: f32[8,32], index: 3, kind: input, shape index: {}]   ;;  %s779_s4 = inlined_call_operand.vmem [shape: f32[1,32], index: 4, kind: input, shape index: {}]   ;;  %s780_s5 = inlined_call_operand.hbm [shape: f32[16,32], index: 5, kind: output, shape index: {}]  }
   0x1   :  { %12 = vsyncpa [#allocation3 + $0x1], 0  ;;  %s652_s18 = smov 0   ;;  %s654_s19 = smov 0  }
   0x2   :  { %s656_s20 = smov 0   ;;  %s658_s21 = smov 0  }
   0x3 LB: > { %s673_s22 = sadd.s32 4294967295, %s616_s21   ;;  %s467_s23 = sadd.s32 4294967294, %s616_s21   ;;  %s616_s21 = sphi %s658_s21, %s786_s21   ;;  %s612_s20 = sphi %s656_s20, %s785_s20   ;;  %s608_s19 = sphi %s654_s19, %s784_s19   ;;  %s604_s18 = sphi %s652_s18, %s783_s18  }
   0x4   : > { %s677_s24 = sadd.s32 1, %s616_s21   ;;  %s135_s25 = sadd.s32 1, %s612_s20 }
   0x5   : > { %s132_s26 = ssub.s32 %s616_s21, %s677_s24  ;;  %p145_p0 = scmp.ne.s32.totalorder %s612_s20, %s608_s19 }
   0x6   : > { %p133_p1 = scmp.eq.s32.totalorder %s132_s26, 0  ;;  %p146_p2 = scmp.eq.s32.totalorder %s673_s22, 1 }
   0x7   : > { %p151_p3 = scmp.ne.s32.totalorder %s608_s19, %s604_s18  ;;  %p152_p4 = scmp.eq.s32.totalorder %s467_s23, 1 }
   0x8   : > { %s688_s27 = scalar_select %p133_p1, %s612_s20, %s135_s25  }
   0x9   : > { %p690_p5 = por %p146_p2, %p145_p0  ;;  %p694_p6 = por %p152_p4, %p151_p3 }
   0xa   : > { %p470_p7 = scmp.ge.s32.totalorder %s616_s21, 1  ;;  %p189_p8 = scmp.lt.s32.totalorder %s616_s21, 3 }
   0xc   : > { %p190_p9 = pnand %p470_p7, %p189_p8 }
   0xd   : > { %v221_v0 = vld [vmem:[%s776_s1] sm:$0xff] (!%p190_p9)  ;;  %v222_v1 = vld [vmem:[%s776_s1 + $0x8] sm:$0xff] (!%p190_p9)  ;;  %v223_v2 = vld [vmem:[%s776_s1 + $0x10] sm:$0xff] (!%p190_p9)  ;;  %v618_v3 = vmov (!%p190_p9), 0.0|0.0   ;;  %vm619_vm0 = vmmov (!%p190_p9), 0   ;;  %v620_v6 = vmov (!%p190_p9), 0.0  }
   0xe   : > { %193 = sbr.rel (%p190_p9) target bundleno = 485 (0x1e5), region = 40  ;;  %504 = vmatprep.subr.bf16.mxu0 (!%p190_p9), %v618_v3  ;;  %v505_v4 = vpack.c.bf16 (!%p190_p9), %v222_v1, %v221_v0  ;;  %v224_v5 = vld [vmem:[%s776_s1 + $0x18] sm:$0xff] (!%p190_p9)  ;;  %496 = vmatprep.mubr.msk.f32.mxu0 (!%p190_p9), %vm619_vm0, %v620_v6  ;;  %p216_p10 = scmp.lt.s32.totalorder (!%p190_p9), %s673_s22, 1  ;;  %vm232_vm1 = vcmask (!%p190_p9), 261120   ;;  %v311_v9 = vld [vmem:[%s778_s3] sm:$0xff] (!%p190_p9)  ;;  %vm319_vm2 = vcmask (!%p190_p9), 64512  }
   0xf   : > { %499 = vmatprep.subr.mxu1 (!%p190_p9), %v620_v6  ;;  %501 = vmatprep.mubr.msk.f32.mxu1 (!%p190_p9), %vm619_vm0, %v620_v6  ;;  %v508_v7 = vpack.c.bf16 (!%p190_p9), %v224_v5, %v223_v2  ;;  %v473_v10 = vld [vmem:[%s777_s2] ss:$0 sm:$0xff] (!%p190_p9)  ;;  %s213_s6 = sand.u32 (!%p190_p9), 1, %s608_s19   ;;  %s478_s10 = sshll.u32 (!%p190_p9), %s673_s22, 7 }
  0x10   : > { %506 = vmatpush3.bf16.msra.mxu0 (!%p190_p9), %v505_v4  ;;  %500 = vmatpush3.msra.mxu1 (!%p190_p9), %v311_v9  ;;  %s471_s7 = sshll.u32 (!%p190_p9), %s213_s6, 3  ;;  %v475_v19 = vld [vmem:[%s779_s4] ss:$0 sm:$0xff] (!%p190_p9)  ;;  %s732_s15 = scalar_lea.hbm (!%p190_p9), %s780_s5, %s478_s10 }
  0x11   : > { %507 = vmatprep.subr.bf16.mxu0 (!%p190_p9), %v618_v3  ;;  %s215_s11 = scalar_lea.vmem (!%p190_p9), [#allocation2], %s471_s7  ;;  %s395_s16 = scalar_lea.sflag (!%p190_p9), [#allocation3], %s213_s6 }
  0x12   : > { %s408_s12 = sshll.u32 (!%p190_p9), %s215_s11, 4  ;;  %s734_s12 = int_to_ptr.vmem [resolvable:$true] %s408_s12 }
  0x14   : > { %509 = vmatpush3.bf16.msra.mxu0 (!%p190_p9), %v508_v7 }
  0x15   : > { %s217_s13 = scalar_select %p216_p10, %s673_s22, 1 }
  0x16   : > { %s621_s22 = smov [#allocation2]  }
  0x17   : > { %s472_s14 = sshll.u32 %s217_s13, 3  ;;  %s558_s23 = sshll.u32 %s621_s22, 4  ;;  %s559_s23 = int_to_ptr.vmem [resolvable:$false] %s558_s23 }
  0x18   : > { %s219_s17 = scalar_lea.vmem %s775_s0, %s472_s14  ;;  %s560_s25 = scalar_lea.vmem %s559_s23, 256 }
  0x19   : > { %v220_v8 = vld [vmem:[%s219_s17] sm:$0xff]  ;;  %s554_s17 = scalar_lea.vmem %s734_s12, 128  ;;  %p561_p0 = scmp.lt.s32.totalorder %s734_s12, %s559_s23 }
  0x1a   : > { %497 = vmatmul.mubr.msk.f32.vlgmr.msra.gmra.mrb[0].mxu0 %vm232_vm1, %v220_v8  ;;  %p555_p11 = scmp.ne.s32.totalorder %s734_s12, %s554_s17  ;;  %p562_p1 = scmp.lt.s32.totalorder %s560_s25, %s554_s17 }
  0x1c   : > { %p556_p12 = pnand %p555_p11, %p690_p5  ;;  %p563_p2 = por %p562_p1, %p561_p0 }
  0x1e   : > { %p557_p13 = pneg %p556_p12 }
  0x20   : > { %p564_p3 = pnand %p563_p2, %p557_p13 }
  0xed   : > { %v302_v11 = vpop.f32.mrb[0].mxu0 }
  0xee   : > { %v303_v12 = vadd.f32 %v473_v10, %v302_v11  ;;  %v498_v13 = vpop.f32.mrb[1].mxu0 }
  0xf0   : > { %v307_v14 = vmul.f32 0.70710677, %v303_v12  ;;  %v306_v16 = vmul.f32 0.5, %v303_v12 }
  0xf2   : > { %552 = verf.f32 %v307_v14 }
  0xfc   : > { %v553_v15 = vpop.eup %552 }
  0xfd   : > { %v309_v17 = vadd.f32 1.0, %v553_v15 }
  0xff   : > { %v310_v18 = vmul.f32 %v309_v17, %v306_v16 }
 0x101   : > { %502 = vmatmul.mubr.msk.f32.vlgmr.msra.gmra.mrb[0].mxu1 %vm319_vm2, %v310_v18 }
 0x1d4   : > { %v389_v20 = vpop.f32.mrb[0].mxu1 }
 0x1d5   : > { %v390_v21 = vadd.f32 %v475_v19, %v389_v20  ;;  %v503_v22 = vpop.f32.mrb[1].mxu1 }
 0x1d7   : > { %393 = vst.msk [vmem:[%s215_s11] sm:$0xff] %vm232_vm1, %v390_v21 }
 0x1d8   : > { %567 = shalt.err (!%p564_p3)
}
 0x1d9   : > { %s568_s26 = scalar_lea.hbm %s732_s15, 128  ;;  %s572_s7 = scalar_lea.hbm %s780_s5, 256 }
 0x1da   : > { %p569_p4 = scmp.ne.s32.totalorder %s732_s15, %s568_s26  ;;  %p573_p9 = scmp.lt.u32.totalorder %s732_s15, %s780_s5 }
 0x1db   : > { %p574_p10 = scmp.lt.u32.totalorder %s572_s7, %s568_s26  ;;  %p576_p12 = scmp.lt.u32.totalorder %s568_s26, %s732_s15 }
 0x1dc   : > { %p570_p7 = pnand %p569_p4, %p690_p5 }
 0x1dd   : > { %p575_p11 = por %p574_p10, %p573_p9 }
 0x1de   : > { %p571_p8 = pneg %p570_p7 }
 0x1df   : > { %p577_p13 = por %p576_p12, %p575_p11 }
 0x1e1   : > { %p578_p0 = pnand %p577_p13, %p571_p8 }
 0x1e3   : > { %581 = shalt.err (!%p578_p0)
}
 0x1e4   : > { %510 = dma.vmem_to_hbm [thread:$0]  (%p690_p5), %s734_s12, 128, %s732_s15, %s395_s16  }
 0x1e5 PF: > { %p516_p1 = scmp.ge.s32.totalorder %s616_s21, 2  ;;  %s420_s10 = sand.u32 1, %s604_s18  }
 0x1e6   : > { %s421_s11 = scalar_lea.sflag [#allocation3], %s420_s10 }
 0x1e7   : > { %p513_p2 = pnand %p516_p1, %p694_p6 }
 0x1e9   : > { %599 = dma.done.wait (!%p513_p2), %s421_s11, 128  }
 0x1ea   : > { %601 = vsyncadd (!%p513_p2), %s421_s11, 4294967168  ;;  %p15_p3 = scmp.ge.s32.totalorder %s677_s24, 4   ;;  %s783_s18 = smov %s608_s19 }
 0x1eb   : > { %s784_s19 = smov %s612_s20  ;;  %s785_s20 = smov %s688_s27 }
 0x1ec   : > { %s786_s21 = smov %s677_s24  ;;  %17 = sbr.rel (!%p15_p3) target bundleno = 3 (0x3), region = 75 }
 0x1f3   :  { %426 = vsyncpa [#allocation3], 1 }
 0x1f4   :  { %428 = vsyncpa [#allocation3 + $0x1], 1 }

// kernel: tpu_custom_call.1
= control target key start
LH: loop header
LB: loop body
LE: loop exit
PB: predicated region body
PF: predicated region fallthrough
CT: control target
= control target key end

     0   :  { %10 = vsyncpa [#allocation3], 0  ;;  %s775_s0 = inlined_call_operand.vmem [shape: f32[16,32], index: 0, kind: input, shape index: {}]   ;;  %s776_s1 = inlined_call_operand.vmem [shape: f32[32,8], index: 1, kind: input, shape index: {}]   ;;  %s777_s2 = inlined_call_operand.vmem [shape: f32[1,8], index: 2, kind: input, shape index: {}]   ;;  %s778_s3 = inlined_call_operand.vmem [shape: f32[8,32], index: 3, kind: input, shape index: {}]   ;;  %s779_s4 = inlined_call_operand.vmem [shape: f32[1,32], index: 4, kind: input, shape index: {}]   ;;  %s780_s5 = inlined_call_operand.hbm [shape: f32[16,32], index: 5, kind: output, shape index: {}]  }
   0x1   :  { %12 = vsyncpa [#allocation3 + $0x1], 0  ;;  %s652_s18 = smov 0   ;;  %s654_s19 = smov 0  }
   0x2   :  { %s656_s20 = smov 0   ;;  %s658_s21 = smov 0  }
   0x3 LB: > { %s673_s22 = sadd.s32 4294967295, %s616_s21   ;;  %s467_s23 = sadd.s32 4294967294, %s616_s21   ;;  %s616_s21 = sphi %s658_s21, %s786_s21   ;;  %s612_s20 = sphi %s656_s20, %s785_s20   ;;  %s608_s19 = sphi %s654_s19, %s784_s19   ;;  %s604_s18 = sphi %s652_s18, %s783_s18  }
   0x4   : > { %s677_s24 = sadd.s32 1, %s616_s21   ;;  %s135_s25 = sadd.s32 1, %s612_s20 }
   0x5   : > { %s132_s26 = ssub.s32 %s616_s21, %s677_s24  ;;  %p145_p0 = scmp.ne.s32.totalorder %s612_s20, %s608_s19 }
   0x6   : > { %p133_p1 = scmp.eq.s32.totalorder %s132_s26, 0  ;;  %p146_p2 = scmp.eq.s32.totalorder %s673_s22, 1 }
   0x7   : > { %p151_p3 = scmp.ne.s32.totalorder %s608_s19, %s604_s18  ;;  %p152_p4 = scmp.eq.s32.totalorder %s467_s23, 1 }
   0x8   : > { %s688_s27 = scalar_select %p133_p1, %s612_s20, %s135_s25  }
   0x9   : > { %p690_p5 = por %p146_p2, %p145_p0  ;;  %p694_p6 = por %p152_p4, %p151_p3 }
   0xa   : > { %p470_p7 = scmp.ge.s32.totalorder %s616_s21, 1  ;;  %p189_p8 = scmp.lt.s32.totalorder %s616_s21, 3 }
   0xc   : > { %p190_p9 = pnand %p470_p7, %p189_p8 }
   0xd   : > { %v221_v0 = vld [vmem:[%s776_s1] sm:$0xff] (!%p190_p9)  ;;  %v222_v1 = vld [vmem:[%s776_s1 + $0x8] sm:$0xff] (!%p190_p9)  ;;  %v223_v2 = vld [vmem:[%s776_s1 + $0x10] sm:$0xff] (!%p190_p9)  ;;  %v618_v3 = vmov (!%p190_p9), 0.0|0.0   ;;  %vm619_vm0 = vmmov (!%p190_p9), 0   ;;  %v620_v6 = vmov (!%p190_p9), 0.0  }
   0xe   : > { %193 = sbr.rel (%p190_p9) target bundleno = 485 (0x1e5), region = 40  ;;  %504 = vmatprep.subr.bf16.mxu0 (!%p190_p9), %v618_v3  ;;  %v505_v4 = vpack.c.bf16 (!%p190_p9), %v222_v1, %v221_v0  ;;  %v224_v5 = vld [vmem:[%s776_s1 + $0x18] sm:$0xff] (!%p190_p9)  ;;  %496 = vmatprep.mubr.msk.f32.mxu0 (!%p190_p9), %vm619_vm0, %v620_v6  ;;  %p216_p10 = scmp.lt.s32.totalorder (!%p190_p9), %s673_s22, 1  ;;  %vm232_vm1 = vcmask (!%p190_p9), 261120   ;;  %v311_v9 = vld [vmem:[%s778_s3] sm:$0xff] (!%p190_p9)  ;;  %vm319_vm2 = vcmask (!%p190_p9), 64512  }
   0xf   : > { %499 = vmatprep.subr.mxu1 (!%p190_p9), %v620_v6  ;;  %501 = vmatprep.mubr.msk.f32.mxu1 (!%p190_p9), %vm619_vm0, %v620_v6  ;;  %v508_v7 = vpack.c.bf16 (!%p190_p9), %v224_v5, %v223_v2  ;;  %v473_v10 = vld [vmem:[%s777_s2] ss:$0 sm:$0xff] (!%p190_p9)  ;;  %s213_s6 = sand.u32 (!%p190_p9), 1, %s608_s19   ;;  %s478_s10 = sshll.u32 (!%p190_p9), %s673_s22, 7 }
  0x10   : > { %506 = vmatpush3.bf16.msra.mxu0 (!%p190_p9), %v505_v4  ;;  %500 = vmatpush3.msra.mxu1 (!%p190_p9), %v311_v9  ;;  %s471_s7 = sshll.u32 (!%p190_p9), %s213_s6, 3  ;;  %v475_v19 = vld [vmem:[%s779_s4] ss:$0 sm:$0xff] (!%p190_p9)  ;;  %s732_s15 = scalar_lea.hbm (!%p190_p9), %s780_s5, %s478_s10 }
  0x11   : > { %507 = vmatprep.subr.bf16.mxu0 (!%p190_p9), %v618_v3  ;;  %s215_s11 = scalar_lea.vmem (!%p190_p9), [#allocation2], %s471_s7  ;;  %s395_s16 = scalar_lea.sflag (!%p190_p9), [#allocation3], %s213_s6 }
  0x12   : > { %s408_s12 = sshll.u32 (!%p190_p9), %s215_s11, 4  ;;  %s734_s12 = int_to_ptr.vmem [resolvable:$true] %s408_s12 }
  0x14   : > { %509 = vmatpush3.bf16.msra.mxu0 (!%p190_p9), %v508_v7 }
  0x15   : > { %s217_s13 = scalar_select %p216_p10, %s673_s22, 1 }
  0x16   : > { %s621_s22 = smov [#allocation2]  }
  0x17   : > { %s472_s14 = sshll.u32 %s217_s13, 3  ;;  %s558_s23 = sshll.u32 %s621_s22, 4  ;;  %s559_s23 = int_to_ptr.vmem [resolvable:$false] %s558_s23 }
  0x18   : > { %s219_s17 = scalar_lea.vmem %s775_s0, %s472_s14  ;;  %s560_s25 = scalar_lea.vmem %s559_s23, 256 }
  0x19   : > { %v220_v8 = vld [vmem:[%s219_s17] sm:$0xff]  ;;  %s554_s17 = scalar_lea.vmem %s734_s12, 128  ;;  %p561_p0 = scmp.lt.s32.totalorder %s734_s12, %s559_s23 }
  0x1a   : > { %497 = vmatmul.mubr.msk.f32.vlgmr.msra.gmra.mrb[0].mxu0 %vm232_vm1, %v220_v8  ;;  %p555_p11 = scmp.ne.s32.totalorder %s734_s12, %s554_s17  ;;  %p562_p1 = scmp.lt.s32.totalorder %s560_s25, %s554_s17 }
  0x1c   : > { %p556_p12 = pnand %p555_p11, %p690_p5  ;;  %p563_p2 = por %p562_p1, %p561_p0 }
  0x1e   : > { %p557_p13 = pneg %p556_p12 }
  0x20   : > { %p564_p3 = pnand %p563_p2, %p557_p13 }
  0xed   : > { %v302_v11 = vpop.f32.mrb[0].mxu0 }
  0xee   : > { %v303_v12 = vadd.f32 %v473_v10, %v302_v11  ;;  %v498_v13 = vpop.f32.mrb[1].mxu0 }
  0xf0   : > { %v307_v14 = vmul.f32 0.70710677, %v303_v12  ;;  %v306_v16 = vmul.f32 0.5, %v303_v12 }
  0xf2   : > { %552 = verf.f32 %v307_v14 }
  0xfc   : > { %v553_v15 = vpop.eup %552 }
  0xfd   : > { %v309_v17 = vadd.f32 1.0, %v553_v15 }
  0xff   : > { %v310_v18 = vmul.f32 %v309_v17, %v306_v16 }
 0x101   : > { %502 = vmatmul.mubr.msk.f32.vlgmr.msra.gmra.mrb[0].mxu1 %vm319_vm2, %v310_v18 }
 0x1d4   : > { %v389_v20 = vpop.f32.mrb[0].mxu1 }
 0x1d5   : > { %v390_v21 = vadd.f32 %v475_v19, %v389_v20  ;;  %v503_v22 = vpop.f32.mrb[1].mxu1 }
 0x1d7   : > { %393 = vst.msk [vmem:[%s215_s11] sm:$0xff] %vm232_vm1, %v390_v21 }
 0x1d8   : > { %567 = shalt.err (!%p564_p3)
}
 0x1d9   : > { %s568_s26 = scalar_lea.hbm %s732_s15, 128  ;;  %s572_s7 = scalar_lea.hbm %s780_s5, 256 }
 0x1da   : > { %p569_p4 = scmp.ne.s32.totalorder %s732_s15, %s568_s26  ;;  %p573_p9 = scmp.lt.u32.totalorder %s732_s15, %s780_s5 }
 0x1db   : > { %p574_p10 = scmp.lt.u32.totalorder %s572_s7, %s568_s26  ;;  %p576_p12 = scmp.lt.u32.totalorder %s568_s26, %s732_s15 }
 0x1dc   : > { %p570_p7 = pnand %p569_p4, %p690_p5 }
 0x1dd   : > { %p575_p11 = por %p574_p10, %p573_p9 }
 0x1de   : > { %p571_p8 = pneg %p570_p7 }
 0x1df   : > { %p577_p13 = por %p576_p12, %p575_p11 }
 0x1e1   : > { %p578_p0 = pnand %p577_p13, %p571_p8 }
 0x1e3   : > { %581 = shalt.err (!%p578_p0)
}
 0x1e4   : > { %510 = dma.vmem_to_hbm [thread:$0]  (%p690_p5), %s734_s12, 128, %s732_s15, %s395_s16  }
 0x1e5 PF: > { %p516_p1 = scmp.ge.s32.totalorder %s616_s21, 2  ;;  %s420_s10 = sand.u32 1, %s604_s18  }
 0x1e6   : > { %s421_s11 = scalar_lea.sflag [#allocation3], %s420_s10 }
 0x1e7   : > { %p513_p2 = pnand %p516_p1, %p694_p6 }
 0x1e9   : > { %599 = dma.done.wait (!%p513_p2), %s421_s11, 128  }
 0x1ea   : > { %601 = vsyncadd (!%p513_p2), %s421_s11, 4294967168  ;;  %p15_p3 = scmp.ge.s32.totalorder %s677_s24, 4   ;;  %s783_s18 = smov %s608_s19 }
 0x1eb   : > { %s784_s19 = smov %s612_s20  ;;  %s785_s20 = smov %s688_s27 }
 0x1ec   : > { %s786_s21 = smov %s677_s24  ;;  %17 = sbr.rel (!%p15_p3) target bundleno = 3 (0x3), region = 75 }
 0x1f3   :  { %426 = vsyncpa [#allocation3], 1 }
 0x1f4   :  { %428 = vsyncpa [#allocation3 + $0x1], 1 }

</bundles_post_ra>
